<compile_context>
chip_gen: v7x
topology: tpu7x:2x2x1
jax: 0.10.0
libtpu: 0.0.40
codegen_flags: <defaults>
</compile_context>

<pallas_src>
import jax
import jax.numpy as jnp
from jax.experimental import pallas as pl
from jax.experimental.pallas import tpu as pltpu


def _mlp_kernel(x_ref, p1_ref, p2_ref, o_ref):
    """Fused 2-layer MLP on one batch tile.

    p1_ref packs [w1; b1] as (nins+1, nhid); p2_ref packs [w2; b2] as
    (nhid+1, nout).  Matmuls run with bf16 operands (MXU-native on
    v5e/v6e/v7x) and f32 accumulation; bias add + tanh stay in f32.
    """
    nins = p1_ref.shape[0] - 1
    nhid = p2_ref.shape[0] - 1

    x = x_ref[...].astype(jnp.bfloat16)
    w1 = p1_ref[:nins, :].astype(jnp.bfloat16)
    b1 = p1_ref[nins:, :]                      # (1, nhid) f32
    w2 = p2_ref[:nhid, :].astype(jnp.bfloat16)
    b2 = p2_ref[nhid:, :]                      # (1, nout) f32

    h = jnp.dot(x, w1, preferred_element_type=jnp.float32) + b1
    h = jnp.tanh(h)
    y = jnp.dot(h.astype(jnp.bfloat16), w2,
                preferred_element_type=jnp.float32) + b2
    o_ref[...] = y.astype(o_ref.dtype)


def _pack_params(w1, b1, w2, b2):
    """Concatenate each layer's weight and bias into one f32 buffer."""
    p1 = jnp.concatenate([w1, b1.reshape(1, -1)], axis=0).astype(jnp.float32)
    p2 = jnp.concatenate([w2, b2.reshape(1, -1)], axis=0).astype(jnp.float32)
    return p1, p2


def net_forward(x, w1, b1, w2, b2, *, block_b=512):
    """Full 2-layer MLP in a single fused Pallas kernel.

    Small / irregular batches use a grid-less call (everything is one VMEM
    block).  Large batches (B % block_b == 0) tile the batch dim on a
    "parallel" grid axis with weights resident in VMEM across steps.
    """
    B, nins = x.shape
    nhid, nout = w2.shape
    assert w1.shape == (nins, nhid)
    p1, p2 = _pack_params(w1, b1, w2, b2)
    out_shape = jax.ShapeDtypeStruct((B, nout), x.dtype)

    if B <= block_b or B % block_b != 0:
        # Launch/DMA-latency-bound regime: no grid, no pipeline machinery.
        vmem = pl.BlockSpec(memory_space=pltpu.MemorySpace.VMEM)
        return pl.pallas_call(
            _mlp_kernel,
            out_shape=out_shape,
            in_specs=[vmem, vmem, vmem],
            out_specs=vmem,
        )(x, p1, p2)

    # Batch-tiled path: BlockSpec double-buffers x / y tiles; params use a
    # constant index map so they stay resident in VMEM across grid steps.
    # TODO(synk): for very large B a lane-dense (transposed) output layout
    # would further reduce masked stores (nout=16 < 128 lanes).
    grid = (B // block_b,)
    return pl.pallas_call(
        _mlp_kernel,
        out_shape=out_shape,
        grid=grid,
        in_specs=[
            pl.BlockSpec((block_b, nins), lambda i: (i, 0)),
            pl.BlockSpec(p1.shape, lambda i: (0, 0)),
            pl.BlockSpec(p2.shape, lambda i: (0, 0)),
        ],
        out_specs=pl.BlockSpec((block_b, nout), lambda i: (i, 0)),
        compiler_params=pltpu.CompilerParams(
            dimension_semantics=("parallel",),
        ),
    )(x, p1, p2)


def _reference(x, w1, b1, w2, b2, *, bf16_matmul):
    """Pure-JAX reference; optionally mimics the kernel's bf16 MXU operands."""
    if bf16_matmul:
        h = jnp.dot(x.astype(jnp.bfloat16), w1.astype(jnp.bfloat16),
                    preferred_element_type=jnp.float32) + b1
        h = jnp.tanh(h)
        return jnp.dot(h.astype(jnp.bfloat16), w2.astype(jnp.bfloat16),
                       preferred_element_type=jnp.float32) + b2
    return jnp.tanh(x @ w1 + b1) @ w2 + b2


if __name__ == "__main__":
    # Module hyper-parameters: nhid = (nins + nout) // 2
    nins, nout = 32, 16
    nhid = int((nins + nout) / 2)  # 24

    key = jax.random.PRNGKey(0)
    kx, kw1, kb1, kw2, kb2, kx2 = jax.random.split(key, 6)

    lim1 = 1.0 / (nins ** 0.5)
    lim2 = 1.0 / (nhid ** 0.5)
    w1 = jax.random.uniform(kw1, (nins, nhid), jnp.float32, -lim1, lim1)
    b1 = jax.random.uniform(kb1, (nhid,), jnp.float32, -lim1, lim1)
    w2 = jax.random.uniform(kw2, (nhid, nout), jnp.float32, -lim2, lim2)
    b2 = jax.random.uniform(kb2, (nout,), jnp.float32, -lim2, lim2)

    ok = True

    # (a) Small batch -> grid-less single-block path.
    x_small = jax.random.normal(kx, (8, nins), dtype=jnp.float32)
    out_small = net_forward(x_small, w1, b1, w2, b2)
    jax.block_until_ready(out_small)
    ref_bf16 = _reference(x_small, w1, b1, w2, b2, bf16_matmul=True)
    ref_f32 = _reference(x_small, w1, b1, w2, b2, bf16_matmul=False)
    ok &= out_small.shape == (8, nout)
    ok &= bool(jnp.allclose(out_small, ref_bf16, atol=1e-3, rtol=1e-3))
    ok &= bool(jnp.allclose(out_small, ref_f32, atol=5e-2, rtol=5e-2))

    # (b) Larger batch -> batch-tiled "parallel" grid path (resident weights).
    x_big = jax.random.normal(kx2, (1024, nins), dtype=jnp.float32)
    out_big = net_forward(x_big, w1, b1, w2, b2, block_b=512)
    jax.block_until_ready(out_big)
    ref_big = _reference(x_big, w1, b1, w2, b2, bf16_matmul=True)
    ok &= out_big.shape == (1024, nout)
    ok &= bool(jnp.allclose(out_big, ref_big, atol=1e-3, rtol=1e-3))

    if ok:
        print("KERNEL_OK")
    else:
        raise SystemExit("KERNEL_MISMATCH")
</pallas_src>

<mosaic_0001>
module attributes {stable_mosaic.version = 11 : i64} {
  func.func @_mlp_kernel(%arg0: memref<8x32xf32, #tpu.memory_space<vmem>>, %arg1: memref<33x24xf32, #tpu.memory_space<vmem>>, %arg2: memref<25x16xf32, #tpu.memory_space<vmem>>, %arg3: memref<8x16xf32, #tpu.memory_space<vmem>>) attributes {dimension_semantics = [], scalar_prefetch = 0 : i64, scratch_operands = 0 : i64, tpu.core_type = #tpu.core_type<tc>} {
    %c0 = arith.constant 0 : index
    %c0_0 = arith.constant 0 : index
    %0 = vector.load %arg0[%c0, %c0_0] : memref<8x32xf32, #tpu.memory_space<vmem>>, vector<8x32xf32>
    %1 = arith.truncf %0 : vector<8x32xf32> to vector<8x32xbf16>
    %c0_1 = arith.constant 0 : index
    %c0_2 = arith.constant 0 : index
    %2 = vector.load %arg1[%c0_1, %c0_2] : memref<33x24xf32, #tpu.memory_space<vmem>>, vector<32x24xf32>
    %3 = arith.truncf %2 : vector<32x24xf32> to vector<32x24xbf16>
    %c32 = arith.constant 32 : index
    %c0_3 = arith.constant 0 : index
    %4 = vector.load %arg1[%c32, %c0_3] : memref<33x24xf32, #tpu.memory_space<vmem>>, vector<1x24xf32>
    %c0_4 = arith.constant 0 : index
    %c0_5 = arith.constant 0 : index
    %5 = vector.load %arg2[%c0_4, %c0_5] : memref<25x16xf32, #tpu.memory_space<vmem>>, vector<24x16xf32>
    %6 = arith.truncf %5 : vector<24x16xf32> to vector<24x16xbf16>
    %c24 = arith.constant 24 : index
    %c0_6 = arith.constant 0 : index
    %7 = vector.load %arg2[%c24, %c0_6] : memref<25x16xf32, #tpu.memory_space<vmem>>, vector<1x16xf32>
    %cst = arith.constant dense<0.000000e+00> : vector<8x24xf32>
    %8 = tpu.matmul %1, %3, %cst {dimension_numbers = #tpu.dot_dimension_numbers<[1], [0], [0], [1], [0, 0, 1, 1], [], []>} : vector<8x32xbf16>, vector<32x24xbf16>, vector<8x24xf32> -> vector<8x24xf32>
    %9 = vector.broadcast %4 : vector<1x24xf32> to vector<8x24xf32>
    %10 = arith.addf %8, %9 : vector<8x24xf32>
    %11 = math.tanh %10 : vector<8x24xf32>
    %12 = arith.truncf %11 : vector<8x24xf32> to vector<8x24xbf16>
    %cst_7 = arith.constant dense<0.000000e+00> : vector<8x16xf32>
    %13 = tpu.matmul %12, %6, %cst_7 {dimension_numbers = #tpu.dot_dimension_numbers<[1], [0], [0], [1], [0, 0, 1, 1], [], []>} : vector<8x24xbf16>, vector<24x16xbf16>, vector<8x16xf32> -> vector<8x16xf32>
    %14 = vector.broadcast %7 : vector<1x16xf32> to vector<8x16xf32>
    %15 = arith.addf %13, %14 : vector<8x16xf32>
    %c0_8 = arith.constant 0 : index
    %c0_9 = arith.constant 0 : index
    %16 = vector.load %arg3[%c0_8, %c0_9] : memref<8x16xf32, #tpu.memory_space<vmem>>, vector<8x16xf32>
    tpu.vector_store %arg3[%c0_8, %c0_9], %15 {strides = array<i32>} : memref<8x16xf32, #tpu.memory_space<vmem>>, vector<8x16xf32>,
    return
  }
}

</mosaic_0001>

<bundles_post_ra>
// kernel: tpu_custom_call.1
= control target key start
LH: loop header
LB: loop body
LE: loop exit
PB: predicated region body
PF: predicated region fallthrough
CT: control target
= control target key end

     0   :  { %v204_v3 = vmov 0.0   ;;  %vm205_vm0 = vmmov 0   ;;  %s269_s0 = inlined_call_operand.vmem [shape: f32[8,32], index: 0, kind: input, shape index: {}]   ;;  %s270_s1 = inlined_call_operand.vmem [shape: f32[33,24], index: 1, kind: input, shape index: {}]   ;;  %s271_s2 = inlined_call_operand.vmem [shape: f32[25,16], index: 2, kind: input, shape index: {}]   ;;  %s272_s3 = inlined_call_operand.hbm [shape: f32[8,16], index: 3, kind: output, shape index: {}]  }
   0x1   :  { %v18_v0 = vld [vmem:[%s270_s1] sm:$0xff]  ;;  %v19_v1 = vld [vmem:[%s270_s1 + $0x8] sm:$0xff]  ;;  %v20_v2 = vld [vmem:[%s270_s1 + $0x10] sm:$0xff]  ;;  %159 = vmatprep.subr.bf16.mxu0 %v204_v3  ;;  %163 = vmatprep.mubr.msk.bf16.mxu0 %vm205_vm0, %v204_v3 }
   0x2   :  { %v22_v4 = vpack.c.bf16 %v19_v1, %v18_v0  ;;  %v21_v5 = vld [vmem:[%s270_s1 + $0x18] sm:$0xff]  ;;  %167 = vmatprep.subr.bf16.mxu1 %v204_v3  ;;  %171 = vmatprep.mubr.msk.bf16.mxu1 %vm205_vm0, %v204_v3 }
   0x3   :  { %8 = vsyncpa [#allocation3], 0  ;;  %v23_v6 = vpack.c.bf16 %v21_v5, %v20_v2  ;;  %v16_v7 = vld [vmem:[%s269_s0] sm:$0xff]  ;;  %vm35_vm1 = vcmask 261120   ;;  %v26_v10 = vld [vmem:[%s271_s2 + $0x8] sm:$0xff]  ;;  %vm89_vm2 = vcmask 1043456  }
   0x4   :  { %160 = vmatpush3.bf16.msra.mxu0 %v22_v4  ;;  %v17_v8 = vpack.c.bf16 %v16_v7, %v16_v7  ;;  %v25_v9 = vld [vmem:[%s271_s2] sm:$0xff]  ;;  %v27_v12 = vld [vmem:[%s271_s2 + $0x10] sm:$0xff]  ;;  %vm85_vm3 = vcmask 195584   ;;  %v151_v23 = vld [vmem:[%s271_s2 + $0x18] ss:$0 sm:$0xff]  ;;  %s206_s4 = smov [#allocation2]  }
   0x5   :  { %161 = vmatprep.subr.bf16.mxu0 %v204_v3  ;;  %v28_v11 = vpack.c.bf16 %v26_v10, %v25_v9  ;;  %v29_v13 = vpack.c.bf16 %v27_v12, %v27_v12  ;;  %v149_v15 = vld [vmem:[%s270_s1 + $0x20] ss:$0 sm:$0xff]  ;;  %s141_s5 = sshll.u32 %s206_s4, 4  ;;  %vm133_vm4 = vcmask 130048   ;;  %s142_s5 = int_to_ptr.vmem [resolvable:$true] %s141_s5 }
   0x6   :  { %s180_s1 = scalar_lea.vmem %s142_s5, 128  ;;  %p185_p1 = scmp.lt.s32.totalorder %s142_s5, %s142_s5 }
   0x7   :  { %168 = vmatpush3.bf16.msra.mxu1 %v28_v11  ;;  %v91_v14 = vsel %vm89_vm2, %v29_v13, 0  ;;  %p181_p0 = scmp.ne.s32.totalorder %s142_s5, %s180_s1  ;;  %p186_p2 = scmp.lt.s32.totalorder %s180_s1, %s180_s1 }
   0x8   :  { %162 = vmatpush3.bf16.msra.mxu0 %v23_v6  ;;  %169 = vmatprep.subr.bf16.mxu1 %v204_v3 }
   0x9   :  { %p187_p3 = por %p186_p2, %p185_p1 }
   0xb   :  { %164 = vmatmul.mubr.msk.bf16.vlgmr.msra.gmra.mrb[0].mxu0 %vm35_vm1, %v17_v8  ;;  %170 = vmatpush3.bf16.msra.mxu1 %v91_v14  ;;  %p188_p4 = pnand %p187_p3, %p181_p0 }
  0xde   :  { %v73_v16 = vpop.f32.mrb[0].mxu0 }
  0xdf   :  { %v74_v17 = vadd.f32 %v149_v15, %v73_v16  ;;  %v165_v18 = vpop.f32.mrb[1].mxu0 }
  0xe0   :  { %v76_v19 = vpop.f32.mrb[2].mxu0 }
  0xe1   :  { %178 = vtanh.f32 %v74_v17  ;;  %v166_v20 = vpop.f32.mrb[3].mxu0 }
  0xeb   :  { %v179_v21 = vpop.eup %178 }
  0xec   :  { %v80_v22 = vpack.c.bf16 %v179_v21, %v179_v21 }
  0xee   :  { %172 = vmatmul.mubr.msk.bf16.vlgmr.msra.gmra.mrb[0].mxu1 %vm85_vm3, %v80_v22 }
 0x1c1   :  { %v127_v24 = vpop.f32.mrb[0].mxu1 }
 0x1c2   :  { %v128_v25 = vadd.f32 %v151_v23, %v127_v24  ;;  %v173_v26 = vpop.f32.mrb[1].mxu1 }
 0x1c3   :  { %v130_v27 = vpop.f32.mrb[2].mxu1 }
 0x1c4   :  { %v174_v28 = vpop.f32.mrb[3].mxu1  ;;  %134 = vst.msk [vmem:[#allocation2] sm:$0xff] %vm133_vm4, %v128_v25 }
 0x1c5   :  { %191 = shalt.err (!%p188_p4)
}
 0x1c6   :  { %s192_s2 = scalar_lea.hbm %s272_s3, 128 }
 0x1c7   :  { %p193_p5 = scmp.ne.s32.totalorder %s272_s3, %s192_s2  ;;  %p196_p6 = scmp.lt.u32.totalorder %s192_s2, %s272_s3 }
 0x1c9   :  { %p198_p7 = pnand %p196_p6, %p193_p5 }
 0x1cb   :  { %201 = shalt.err (!%p198_p7)
}
 0x1cc   :  { %144 = dma.vmem_to_hbm [thread:$0]  %s142_s5, 128, %s272_s3, [#allocation3]  }
 0x1cd   :  { %202 = dma.done.wait [#allocation3], 128  }
 0x1ce   :  { %203 = vsyncadd [#allocation3], 4294967168 }
 0x1cf   :  { %148 = vsyncpa [#allocation3], 1 }

</bundles_post_ra>
